<compile_context>
chip_gen: v7x
topology: tpu7x:2x2x1
jax: 0.10.0
libtpu: 0.0.40
codegen_flags: <defaults>
</compile_context>

<pallas_src>
import functools

import jax
import jax.numpy as jnp
from jax.experimental import pallas as pl
from jax.experimental.pallas import tpu as pltpu


def _round_up(n, m):
    return ((n + m - 1) // m) * m


def _kernel(x1_ref, x2_ref, w1_ref, w2_ref, wb_ref, o_ref, *, alpha, wb_on_h1):
    # Contract on the last dim of both operands -> feeds the MXU with no transposes.
    dn = (((1,), (1,)), ((), ()))

    # FC1 / FC2 with bias folded into the padded K lane (x carries a 1.0 there).
    h1 = jax.lax.dot_general(x1_ref[...], w1_ref[...], dn,
                             preferred_element_type=jnp.float32)
    h1 = jnp.where(h1 > 0, h1, alpha * h1)                       # (N1p, Dp) f32

    h2 = jax.lax.dot_general(x2_ref[...], w2_ref[...], dn,
                             preferred_element_type=jnp.float32)
    h2 = jnp.where(h2 > 0, h2, alpha * h2)                       # (N2p, Dp) f32

    # out = h1 @ Wb @ h2^T ; apply the (Dp, Dp) matrix to the smaller side.
    if wb_on_h1:
        t = jnp.dot(h1, wb_ref[...], preferred_element_type=jnp.float32)     # (N1p, Dp)
        o_ref[...] = jax.lax.dot_general(t, h2, dn,
                                         preferred_element_type=jnp.float32)  # (N1p, N2p)
    else:
        t = jax.lax.dot_general(h2, wb_ref[...], dn,
                                preferred_element_type=jnp.float32)            # h2 @ Wb^T
        o_ref[...] = jax.lax.dot_general(h1, t, dn,
                                         preferred_element_type=jnp.float32)  # (N1p, N2p)


def make_attribute_completion(fc1_w, fc1_b, fc2_w, fc2_b, W, *, alpha=0.2,
                              compute_dtype=jnp.float32):
    """Pack parameters once; return a jitted forward(x1, x2) -> (n1, n2)."""
    num_heads, hidden, in_dim = fc1_w.shape
    D = num_heads * hidden
    f32 = jnp.float32

    Kp = _round_up(in_dim + 1, 128)   # +1 lane carries the folded bias; rest exact zeros
    Dp = _round_up(D, 128)            # stacked-heads hidden width

    def pack_linear(w, b):
        wd = jnp.concatenate([w.reshape(D, in_dim).astype(f32),
                              b.reshape(D, 1).astype(f32)], axis=1)         # (D, in_dim+1)
        wd = jnp.pad(wd, ((0, Dp - D), (0, Kp - (in_dim + 1))))
        return wd.astype(compute_dtype)

    w1p = pack_linear(fc1_w, fc1_b)
    w2p = pack_linear(fc2_w, fc2_b)

    # Block-diagonal bilinear matrix with the 1/num_heads mean folded in (built once).
    inv = 1.0 / num_heads
    wb = jax.scipy.linalg.block_diag(*[W[h].astype(f32) * inv for h in range(num_heads)])
    wb = jnp.pad(wb, ((0, Dp - D), (0, Dp - D)))                              # stays f32

    def forward(x1, x2):
        n1, n2 = x1.shape[0], x2.shape[0]
        N1p = _round_up(n1, 8)        # sublane multiple
        N2p = _round_up(n2, 128)      # lane-dense output width -> unmasked vst
        wb_on_h1 = n1 <= n2

        def pad_x(x, rows):
            xe = jnp.concatenate([x.astype(f32),
                                  jnp.ones((x.shape[0], 1), f32)], axis=1)    # bias lane
            xe = jnp.pad(xe, ((0, rows - x.shape[0]), (0, Kp - (in_dim + 1))))
            return xe.astype(compute_dtype)

        x1p = pad_x(x1, N1p)
        x2p = pad_x(x2, N2p)

        small = N1p if wb_on_h1 else N2p
        itm = jnp.dtype(compute_dtype).itemsize
        cost = pl.CostEstimate(
            flops=2 * (N1p * Kp * Dp + N2p * Kp * Dp + small * Dp * Dp + N1p * Dp * N2p),
            transcendentals=0,
            bytes_accessed=((N1p * Kp + N2p * Kp + 2 * Dp * Kp) * itm
                            + Dp * Dp * 4 + N1p * N2p * 4),
        )

        kernel = functools.partial(_kernel, alpha=alpha, wb_on_h1=wb_on_h1)
        out = pl.pallas_call(
            kernel,
            out_shape=jax.ShapeDtypeStruct((N1p, N2p), f32),
            in_specs=[pl.BlockSpec(memory_space=pltpu.MemorySpace.VMEM)
                      for _ in range(5)],
            out_specs=pl.BlockSpec(memory_space=pltpu.MemorySpace.VMEM),
            cost_estimate=cost,
        )(x1p, x2p, w1p, w2p, wb)

        return out[:n1, :n2]

    return jax.jit(forward)


def reference(x1, x2, fc1_w, fc1_b, fc2_w, fc2_b, W, alpha=0.2):
    """Pure-JAX reference mirroring the PyTorch forward (eval mode)."""
    def lrelu(v):
        return jnp.where(v > 0, v, alpha * v)

    outs = []
    for h in range(fc1_w.shape[0]):
        h1 = lrelu(x1 @ fc1_w[h].T + fc1_b[h])
        h2 = lrelu(x2 @ fc2_w[h].T + fc2_b[h])
        outs.append(h1 @ (W[h] @ h2.T))
    return jnp.mean(jnp.stack(outs, 0), axis=0)


if __name__ == "__main__":
    # Small, module-consistent shapes.
    N1, N2 = 8, 8
    IN_DIM = 16
    HIDDEN = 32
    NUM_HEADS = 4
    ALPHA = 0.2

    key = jax.random.PRNGKey(0)
    ks = jax.random.split(key, 7)

    x1 = jax.random.normal(ks[0], (N1, IN_DIM), jnp.float32)
    x2 = jax.random.normal(ks[1], (N2, IN_DIM), jnp.float32)

    # Deterministic parameter init (mimicking shapes from __init__):
    #   W       : xavier_normal with gain 1.414 -> std = 1.414*sqrt(2/(h+h))
    #   fc1/fc2 : nn.Linear default uniform(-1/sqrt(in_dim), 1/sqrt(in_dim))
    w_std = 1.414 * jnp.sqrt(2.0 / (HIDDEN + HIDDEN))
    W = w_std * jax.random.normal(ks[2], (NUM_HEADS, HIDDEN, HIDDEN), jnp.float32)

    lin_bound = 1.0 / jnp.sqrt(IN_DIM)
    fc1_w = jax.random.uniform(ks[3], (NUM_HEADS, HIDDEN, IN_DIM), jnp.float32,
                               -lin_bound, lin_bound)
    fc1_b = jax.random.uniform(ks[4], (NUM_HEADS, HIDDEN), jnp.float32,
                               -lin_bound, lin_bound)
    fc2_w = jax.random.uniform(ks[5], (NUM_HEADS, HIDDEN, IN_DIM), jnp.float32,
                               -lin_bound, lin_bound)
    fc2_b = jax.random.uniform(ks[6], (NUM_HEADS, HIDDEN), jnp.float32,
                               -lin_bound, lin_bound)

    # Pack parameters once (weights + block-diag bilinear), then call the hot path.
    attr_complete = make_attribute_completion(fc1_w, fc1_b, fc2_w, fc2_b, W,
                                              alpha=ALPHA)
    out = attr_complete(x1, x2)
    out = jax.block_until_ready(out)

    ref = reference(x1, x2, fc1_w, fc1_b, fc2_w, fc2_b, W, alpha=ALPHA)
    assert out.shape == (N1, N2)
    assert jnp.allclose(out, ref, atol=1e-4, rtol=1e-3), (
        f"max abs err {jnp.max(jnp.abs(out - ref))}")

    print("KERNEL_OK")
</pallas_src>

<mosaic_0001>
module attributes {stable_mosaic.version = 11 : i64} {
  func.func @_kernel(%arg0: memref<8x128xf32, #tpu.memory_space<vmem>>, %arg1: memref<128x128xf32, #tpu.memory_space<vmem>>, %arg2: memref<128x128xf32, #tpu.memory_space<vmem>>, %arg3: memref<128x128xf32, #tpu.memory_space<vmem>>, %arg4: memref<128x128xf32, #tpu.memory_space<vmem>>, %arg5: memref<8x128xf32, #tpu.memory_space<vmem>>) attributes {dimension_semantics = [], scalar_prefetch = 0 : i64, scratch_operands = 0 : i64, tpu.core_type = #tpu.core_type<tc>} {
    %c0 = arith.constant 0 : index
    %c0_0 = arith.constant 0 : index
    %0 = vector.load %arg0[%c0, %c0_0] : memref<8x128xf32, #tpu.memory_space<vmem>>, vector<8x128xf32>
    %c0_1 = arith.constant 0 : index
    %c0_2 = arith.constant 0 : index
    %1 = vector.load %arg2[%c0_1, %c0_2] : memref<128x128xf32, #tpu.memory_space<vmem>>, vector<128x128xf32>
    %cst = arith.constant dense<0.000000e+00> : vector<8x128xf32>
    %2 = tpu.matmul %0, %1, %cst {dimension_numbers = #tpu.dot_dimension_numbers<[1], [1], [0], [0], [0, 0, 1, 0], [], []>} : vector<8x128xf32>, vector<128x128xf32>, vector<8x128xf32> -> vector<8x128xf32>
    %cst_3 = arith.constant 0.000000e+00 : f32
    %3 = vector.broadcast %cst_3 : f32 to vector<8x128xf32>
    %4 = arith.cmpf ogt, %2, %3 : vector<8x128xf32>
    %cst_4 = arith.constant 2.000000e-01 : f32
    %5 = vector.broadcast %cst_4 : f32 to vector<8x128xf32>
    %6 = arith.mulf %5, %2 : vector<8x128xf32>
    %7 = arith.select %4, %2, %6 : vector<8x128xi1>, vector<8x128xf32>
    %c0_5 = arith.constant 0 : index
    %c0_6 = arith.constant 0 : index
    %8 = vector.load %arg1[%c0_5, %c0_6] : memref<128x128xf32, #tpu.memory_space<vmem>>, vector<128x128xf32>
    %c0_7 = arith.constant 0 : index
    %c0_8 = arith.constant 0 : index
    %9 = vector.load %arg3[%c0_7, %c0_8] : memref<128x128xf32, #tpu.memory_space<vmem>>, vector<128x128xf32>
    %cst_9 = arith.constant dense<0.000000e+00> : vector<128x128xf32>
    %10 = tpu.matmul %8, %9, %cst_9 {dimension_numbers = #tpu.dot_dimension_numbers<[1], [1], [0], [0], [0, 0, 1, 0], [], []>} : vector<128x128xf32>, vector<128x128xf32>, vector<128x128xf32> -> vector<128x128xf32>
    %cst_10 = arith.constant 0.000000e+00 : f32
    %11 = vector.broadcast %cst_10 : f32 to vector<128x128xf32>
    %12 = arith.cmpf ogt, %10, %11 : vector<128x128xf32>
    %cst_11 = arith.constant 2.000000e-01 : f32
    %13 = vector.broadcast %cst_11 : f32 to vector<128x128xf32>
    %14 = arith.mulf %13, %10 : vector<128x128xf32>
    %15 = arith.select %12, %10, %14 : vector<128x128xi1>, vector<128x128xf32>
    %c0_12 = arith.constant 0 : index
    %c0_13 = arith.constant 0 : index
    %16 = vector.load %arg4[%c0_12, %c0_13] : memref<128x128xf32, #tpu.memory_space<vmem>>, vector<128x128xf32>
    %cst_14 = arith.constant dense<0.000000e+00> : vector<8x128xf32>
    %17 = tpu.matmul %7, %16, %cst_14 {dimension_numbers = #tpu.dot_dimension_numbers<[1], [0], [0], [1], [0, 0, 1, 1], [], []>} : vector<8x128xf32>, vector<128x128xf32>, vector<8x128xf32> -> vector<8x128xf32>
    %cst_15 = arith.constant dense<0.000000e+00> : vector<8x128xf32>
    %18 = tpu.matmul %17, %15, %cst_15 {dimension_numbers = #tpu.dot_dimension_numbers<[1], [1], [0], [0], [0, 0, 1, 0], [], []>} : vector<8x128xf32>, vector<128x128xf32>, vector<8x128xf32> -> vector<8x128xf32>
    %c0_16 = arith.constant 0 : index
    %c0_17 = arith.constant 0 : index
    %19 = vector.load %arg5[%c0_16, %c0_17] : memref<8x128xf32, #tpu.memory_space<vmem>>, vector<8x128xf32>
    tpu.vector_store %arg5[%c0_16, %c0_17], %18 {strides = array<i32>} : memref<8x128xf32, #tpu.memory_space<vmem>>, vector<8x128xf32>,
    return
  }
}

</mosaic_0001>

<bundles_post_ra>
// kernel: forward.1
= control target key start
LH: loop header
LB: loop body
LE: loop exit
PB: predicated region body
PF: predicated region fallthrough
CT: control target
= control target key end

     0   :  { %10 = vsyncpa [#allocation3], 0  ;;  %s1168_s0 = inlined_call_operand.vmem [shape: f32[8,128], index: 0, kind: input, shape index: {}]   ;;  %s1169_s1 = inlined_call_operand.vmem [shape: f32[128,128], index: 1, kind: input, shape index: {}]   ;;  %s1170_s2 = inlined_call_operand.hbm [shape: f32[128,128], index: 2, kind: input, shape index: {}]   ;;  %s1171_s3 = inlined_call_operand.hbm [shape: f32[128,128], index: 3, kind: input, shape index: {}]   ;;  %s1172_s4 = inlined_call_operand.vmem [shape: f32[128,128], index: 4, kind: input, shape index: {}]   ;;  %s1173_s5 = inlined_call_operand.hbm [shape: f32[8,128], index: 5, kind: output, shape index: {}]  }
   0x1   :  { %11 = vsyncpa [#allocation6], 0 }
   0x2   :  { %12 = vsyncpa [#allocation4], 0  ;;  %s965_s18 = smov [#allocation2]   ;;  %s893_s22 = scalar_lea.hbm %s1170_s2, 2048 }
   0x3   :  { %s22_s19 = sshll.u32 %s965_s18, 4  ;;  %p894_p0 = scmp.ne.s32.totalorder %s1170_s2, %s893_s22  ;;  %s23_s19 = int_to_ptr.vmem [resolvable:$true] %s22_s19 }
   0x4   :  { %p897_p1 = scmp.lt.u32.totalorder %s893_s22, %s1170_s2 }
   0x6   :  { %p899_p2 = pnand %p897_p1, %p894_p0 }
   0x8   :  { %902 = shalt.err (!%p899_p2)
}
   0x9   :  { %s903_s27 = scalar_lea.vmem %s23_s19, 2048  ;;  %p908_p4 = scmp.lt.s32.totalorder %s23_s19, %s23_s19 }
   0xa   :  { %p904_p3 = scmp.ne.s32.totalorder %s23_s19, %s903_s27  ;;  %p909_p5 = scmp.lt.s32.totalorder %s903_s27, %s903_s27 }
   0xc   :  { %p910_p6 = por %p909_p5, %p908_p4 }
   0xe   :  { %p911_p7 = pnand %p910_p6, %p904_p3 }
  0x10   :  { %914 = shalt.err (!%p911_p7)
}
  0x11   :  { %s966_s28 = smov 128   ;;  %s967_s29 = smov 8  }
  0x12   :  { %28 = dma.hbm_to_vmem [thread:$0]  %s1170_s2, 2048, %s23_s19, [#allocation3], %s966_s28, %s966_s28, %s967_s29  }
  0x13   :  { %s968_s7 = smov [#allocation5]   ;;  %s915_s11 = scalar_lea.hbm %s1171_s3, 2048 }
  0x14   :  { %s34_s8 = sshll.u32 %s968_s7, 4  ;;  %p916_p8 = scmp.ne.s32.totalorder %s1171_s3, %s915_s11  ;;  %s35_s8 = int_to_ptr.vmem [resolvable:$true] %s34_s8 }
  0x15   :  { %p919_p9 = scmp.lt.u32.totalorder %s915_s11, %s1171_s3 }
  0x17   :  { %p921_p10 = pnand %p919_p9, %p916_p8 }
  0x19   :  { %924 = shalt.err (!%p921_p10)
}
  0x1a   :  { %s925_s16 = scalar_lea.vmem %s35_s8, 2048  ;;  %p930_p12 = scmp.lt.s32.totalorder %s35_s8, %s35_s8 }
  0x1b   :  { %p926_p11 = scmp.ne.s32.totalorder %s35_s8, %s925_s16  ;;  %p931_p13 = scmp.lt.s32.totalorder %s925_s16, %s925_s16 }
  0x1d   :  { %p932_p0 = por %p931_p13, %p930_p12 }
  0x1f   :  { %p933_p1 = pnand %p932_p0, %p926_p11 }
  0x21   :  { %936 = shalt.err (!%p933_p1)
}
  0x22   :  { %40 = dma.hbm_to_vmem [thread:$0]  %s1171_s3, 2048, %s35_s8, [#allocation6], %s966_s28, %s966_s28, %s967_s29  }
  0x23   :  { %959 = dma.done.wait [#allocation3], 2048  }
  0x24   :  { %960 = vsyncadd [#allocation3], 4294965248 }
  0x25   :  { %961 = dma.done.wait [#allocation6], 2048  }
  0x26   :  { %962 = vsyncadd [#allocation6], 4294965248  ;;  %v969_v0 = vmov 0.0|0.0   ;;  %vm970_vm0 = vmmov 0   ;;  %v971_v1 = vmov 0.0   ;;  %v50_v2 = vld [vmem:[#allocation2] sm:$0xff] }
  0x27   :  { %781 = vmatprep.subr.bf16.mxu0 %v969_v0  ;;  %652 = vmatprep.mubr.msk.f32.mxu0 %vm970_vm0, %v971_v1  ;;  %v51_v3 = vld [vmem:[#allocation2 + $0x8] sm:$0xff]  ;;  %v52_v5 = vld [vmem:[#allocation2 + $0x10] sm:$0xff]  ;;  %v53_v6 = vld [vmem:[#allocation2 + $0x18] sm:$0xff] }
  0x28   :  { %v782_v4 = vpack.c.bf16 %v51_v3, %v50_v2  ;;  %v155_v7 = vld [vmem:[#allocation5] sm:$0xff]  ;;  %v156_v8 = vld [vmem:[#allocation5 + $0x8] sm:$0xff]  ;;  %v157_v9 = vld [vmem:[#allocation5 + $0x10] sm:$0xff]  ;;  %v785_v11 = vpack.c.bf16 %v53_v6, %v52_v5 }
  0x29   :  { %v158_v10 = vld [vmem:[#allocation5 + $0x18] sm:$0xff]  ;;  %v805_v12 = vpack.c.bf16 %v156_v8, %v155_v7  ;;  %v54_v14 = vld [vmem:[#allocation2 + $0x20] sm:$0xff]  ;;  %v55_v16 = vld [vmem:[#allocation2 + $0x28] sm:$0xff] }
  0x2a   :  { %783 = vmatpush3.bf16.xpose.msra.mxu0 %v782_v4  ;;  %v809_v13 = vpack.c.bf16 %v158_v10, %v157_v9  ;;  %v139_v15 = vld [vmem:[%s1169_s1] sm:$0xff]  ;;  %v159_v17 = vld [vmem:[#allocation5 + $0x20] sm:$0xff]  ;;  %v160_v18 = vld [vmem:[#allocation5 + $0x28] sm:$0xff]  ;;  %v788_v19 = vpack.c.bf16 %v55_v16, %v54_v14 }
  0x2b   :  { %784 = vmatprep.subr.bf16.mxu0 %v969_v0  ;;  %806 = vmatprep.subr.bf16.mxu1 %v805_v12  ;;  %v813_v20 = vpack.c.bf16 %v160_v18, %v159_v17  ;;  %v56_v21 = vld [vmem:[#allocation2 + $0x30] sm:$0xff]  ;;  %v57_v22 = vld [vmem:[#allocation2 + $0x38] sm:$0xff]  ;;  %v58_v27 = vld [vmem:[#allocation2 + $0x40] sm:$0xff] }
  0x2c   :  { %808 = vmatpush3.bf16.xpose.msra.mxu1 %v805_v12  ;;  %687 = vmatprep.mubr.f32.mxu1 %v139_v15  ;;  %v161_v23 = vld [vmem:[#allocation5 + $0x30] sm:$0xff]  ;;  %v162_v24 = vld [vmem:[#allocation5 + $0x38] sm:$0xff]  ;;  %v791_v25 = vpack.c.bf16 %v57_v22, %v56_v21  ;;  %v59_v28 = vld [vmem:[#allocation2 + $0x48] sm:$0xff] }
  0x2d   :  { %810 = vmatprep.subr.bf16.mxu1 %v809_v13  ;;  %v817_v26 = vpack.c.bf16 %v162_v24, %v161_v23  ;;  %v163_v29 = vld [vmem:[#allocation5 + $0x40] sm:$0xff]  ;;  %v164_v30 = vld [vmem:[#allocation5 + $0x48] sm:$0xff]  ;;  %v794_v31 = vpack.c.bf16 %v59_v28, %v58_v27  ;;  %v60_v33 = vld [vmem:[#allocation2 + $0x50] sm:$0xff] }
  0x2e   :  { %v821_v32 = vpack.c.bf16 %v164_v30, %v163_v29  ;;  %v61_v34 = vld [vmem:[#allocation2 + $0x58] sm:$0xff]  ;;  %v165_v35 = vld [vmem:[#allocation5 + $0x50] sm:$0xff]  ;;  %v62_v39 = vld [vmem:[#allocation2 + $0x60] sm:$0xff] }
  0x2f   :  { %v166_v36 = vld [vmem:[#allocation5 + $0x58] sm:$0xff]  ;;  %v797_v37 = vpack.c.bf16 %v61_v34, %v60_v33  ;;  %v63_v40 = vld [vmem:[#allocation2 + $0x68] sm:$0xff]  ;;  %v167_v41 = vld [vmem:[#allocation5 + $0x60] sm:$0xff] }
  0x30   :  { %v825_v38 = vpack.c.bf16 %v166_v36, %v165_v35  ;;  %v168_v42 = vld [vmem:[#allocation5 + $0x68] sm:$0xff]  ;;  %v800_v43 = vpack.c.bf16 %v63_v40, %v62_v39  ;;  %v64_v45 = vld [vmem:[#allocation2 + $0x70] sm:$0xff]  ;;  %v65_v46 = vld [vmem:[#allocation2 + $0x78] sm:$0xff] }
  0x31   :  { %v829_v44 = vpack.c.bf16 %v168_v42, %v167_v41  ;;  %v169_v47 = vld [vmem:[#allocation5 + $0x70] sm:$0xff]  ;;  %v170_v48 = vld [vmem:[#allocation5 + $0x78] sm:$0xff]  ;;  %v803_v49 = vpack.c.bf16 %v65_v46, %v64_v45  ;;  %v365_v52 = vld [vmem:[%s1172_s4 + $0x8] sm:$0xff] }
  0x32   :  { %786 = vmatpush3.bf16.xpose.msra.mxu0 %v785_v11  ;;  %v833_v50 = vpack.c.bf16 %v170_v48, %v169_v47  ;;  %v364_v51 = vld [vmem:[%s1172_s4] sm:$0xff]  ;;  %v366_v55 = vld [vmem:[%s1172_s4 + $0x10] sm:$0xff]  ;;  %v367_v56 = vld [vmem:[%s1172_s4 + $0x18] sm:$0xff] }
  0x33   :  { %787 = vmatprep.subr.bf16.mxu0 %v969_v0  ;;  %v49_v53 = vld [vmem:[%s1168_s0] sm:$0xff]  ;;  %v838_v54 = vpack.c.bf16 %v365_v52, %v364_v51  ;;  %v841_v57 = vpack.c.bf16 %v367_v56, %v366_v55  ;;  %v369_v59 = vld [vmem:[%s1172_s4 + $0x28] sm:$0xff]  ;;  %v141_v61 = vld [vmem:[%s1169_s1 + $0x10] sm:$0xff] }
  0x34   :  { %812 = vmatpush3.bf16.xpose.msra.mxu1 %v809_v13  ;;  %v368_v58 = vld [vmem:[%s1172_s4 + $0x20] sm:$0xff]  ;;  %v140_v60 = vld [vmem:[%s1169_s1 + $0x8] sm:$0xff]  ;;  %v370_v63 = vld [vmem:[%s1172_s4 + $0x30] sm:$0xff] }
  0x35   :  { %814 = vmatprep.subr.bf16.mxu1 %v813_v20  ;;  %v844_v62 = vpack.c.bf16 %v369_v59, %v368_v58  ;;  %v371_v2 = vld [vmem:[%s1172_s4 + $0x38] sm:$0xff]  ;;  %v143_v4 = vld [vmem:[%s1169_s1 + $0x20] sm:$0xff]  ;;  %v373_v7 = vld [vmem:[%s1172_s4 + $0x48] sm:$0xff] }
  0x36   :  { %v142_v3 = vld [vmem:[%s1169_s1 + $0x18] sm:$0xff]  ;;  %v847_v5 = vpack.c.bf16 %v371_v2, %v370_v63  ;;  %v372_v6 = vld [vmem:[%s1172_s4 + $0x40] sm:$0xff]  ;;  %v144_v8 = vld [vmem:[%s1169_s1 + $0x28] sm:$0xff] }
  0x37   :  { %v145_v9 = vld [vmem:[%s1169_s1 + $0x30] sm:$0xff]  ;;  %v850_v10 = vpack.c.bf16 %v373_v7, %v372_v6  ;;  %v375_v12 = vld [vmem:[%s1172_s4 + $0x58] sm:$0xff]  ;;  %v147_v14 = vld [vmem:[%s1169_s1 + $0x40] sm:$0xff] }
  0x38   :  { %v374_v11 = vld [vmem:[%s1172_s4 + $0x50] sm:$0xff]  ;;  %v146_v13 = vld [vmem:[%s1169_s1 + $0x38] sm:$0xff]  ;;  %v376_v16 = vld [vmem:[%s1172_s4 + $0x60] sm:$0xff] }
  0x39   :  { %v853_v15 = vpack.c.bf16 %v375_v12, %v374_v11  ;;  %v377_v17 = vld [vmem:[%s1172_s4 + $0x68] sm:$0xff]  ;;  %v150_v21 = vld [vmem:[%s1169_s1 + $0x58] sm:$0xff]  ;;  %v151_v22 = vld [vmem:[%s1169_s1 + $0x60] sm:$0xff] }
  0x3a   :  { %789 = vmatpush3.bf16.xpose.msra.mxu0 %v788_v19  ;;  %v148_v18 = vld [vmem:[%s1169_s1 + $0x48] sm:$0xff]  ;;  %v149_v19 = vld [vmem:[%s1169_s1 + $0x50] sm:$0xff]  ;;  %v379_v27 = vld [vmem:[%s1172_s4 + $0x78] sm:$0xff] }
  0x3b   :  { %790 = vmatprep.subr.bf16.mxu0 %v969_v0  ;;  %v152_v23 = vld [vmem:[%s1169_s1 + $0x68] sm:$0xff]  ;;  %v153_v24 = vld [vmem:[%s1169_s1 + $0x70] sm:$0xff] }
  0x3c   :  { %816 = vmatpush3.bf16.xpose.msra.mxu1 %v813_v20  ;;  %v856_v20 = vpack.c.bf16 %v377_v17, %v376_v16 }
  0x3d   :  { %818 = vmatprep.subr.bf16.mxu1 %v817_v26 }
  0x42   :  { %792 = vmatpush3.bf16.xpose.msra.mxu0 %v791_v25  ;;  %v154_v25 = vld [vmem:[%s1169_s1 + $0x78] sm:$0xff]  ;;  %s972_s1 = smov [#allocation7]  }
  0x43   :  { %793 = vmatprep.subr.bf16.mxu0 %v969_v0 }
  0x44   :  { %820 = vmatpush3.bf16.xpose.msra.mxu1 %v817_v26  ;;  %v378_v26 = vld [vmem:[%s1172_s4 + $0x70] sm:$0xff]  ;;  %s527_s4 = sshll.u32 %s972_s1, 4  ;;  %s528_s4 = int_to_ptr.vmem [resolvable:$true] %s527_s4 }
  0x45   :  { %822 = vmatprep.subr.bf16.mxu1 %v821_v32  ;;  %v859_v28 = vpack.c.bf16 %v379_v27, %v378_v26  ;;  %s937_s27 = scalar_lea.vmem %s528_s4, 128  ;;  %p942_p3 = scmp.lt.s32.totalorder %s528_s4, %s528_s4 }
  0x46   :  { %p938_p2 = scmp.ne.s32.totalorder %s528_s4, %s937_s27  ;;  %p943_p4 = scmp.lt.s32.totalorder %s937_s27, %s937_s27 }
  0x48   :  { %p944_p5 = por %p943_p4, %p942_p3 }
  0x4a   :  { %795 = vmatpush3.bf16.xpose.msra.mxu0 %v794_v31  ;;  %p945_p6 = pnand %p944_p5, %p938_p2 }
  0x4b   :  { %796 = vmatprep.subr.bf16.mxu0 %v969_v0 }
  0x4c   :  { %824 = vmatpush3.bf16.xpose.msra.mxu1 %v821_v32 }
  0x4d   :  { %826 = vmatprep.subr.bf16.mxu1 %v825_v38 }
  0x52   :  { %798 = vmatpush3.bf16.xpose.msra.mxu0 %v797_v37 }
  0x53   :  { %799 = vmatprep.subr.bf16.mxu0 %v969_v0 }
  0x54   :  { %828 = vmatpush3.bf16.xpose.msra.mxu1 %v825_v38 }
  0x55   :  { %830 = vmatprep.subr.bf16.mxu1 %v829_v44 }
  0x5a   :  { %801 = vmatpush3.bf16.xpose.msra.mxu0 %v800_v43 }
  0x5b   :  { %802 = vmatprep.subr.bf16.mxu0 %v969_v0 }
  0x5c   :  { %832 = vmatpush3.bf16.xpose.msra.mxu1 %v829_v44 }
  0x5d   :  { %834 = vmatprep.subr.bf16.mxu1 %v833_v50 }
  0x62   :  { %804 = vmatpush3.bf16.xpose.msra.mxu0 %v803_v49 }
  0x63   :  { %837 = vmatprep.subr.bf16.mxu0 %v969_v0 }
  0x64   :  { %836 = vmatpush3.bf16.xpose.msra.mxu1 %v833_v50 }
  0x65   :  { %861 = vmatprep.subr.bf16.mxu1 %v969_v0 }
  0x69   :  { %653 = vmatmul.mubr.f32.vlgmr.msra.gmra.mrb[0].mxu0 %v49_v53 }
  0x6a   :  { %839 = vmatpush3.bf16.msra.mxu0 %v838_v54  ;;  %743 = vmatprep.mubr.msk.f32.mxu0 %vm970_vm0, %v971_v1 }
  0x6b   :  { %840 = vmatprep.subr.bf16.mxu0 %v969_v0  ;;  %688 = vmatmul.mubr.f32.vlgmr.msra.gmra.mrb[0].mxu1 %v140_v60 }
  0x6c   :  { %690 = vmatprep.mubr.f32.mxu1 %v141_v61 }
  0x6e   :  { %842 = vmatpush3.bf16.msra.mxu0 %v841_v57 }
  0x6f   :  { %843 = vmatprep.subr.bf16.mxu0 %v969_v0  ;;  %691 = vmatmul.mubr.f32.gmra.mrb[2].mxu1 %v142_v3 }
  0x70   :  { %693 = vmatprep.mubr.f32.mxu1 %v143_v4 }
  0x72   :  { %845 = vmatpush3.bf16.msra.mxu0 %v844_v62 }
  0x73   :  { %846 = vmatprep.subr.bf16.mxu0 %v969_v0  ;;  %694 = vmatmul.mubr.f32.gmra.mrb[4].mxu1 %v144_v8 }
  0x74   :  { %696 = vmatprep.mubr.f32.mxu1 %v145_v9 }
  0x76   :  { %848 = vmatpush3.bf16.msra.mxu0 %v847_v5 }
  0x77   :  { %849 = vmatprep.subr.bf16.mxu0 %v969_v0  ;;  %697 = vmatmul.mubr.f32.gmra.mrb[6].mxu1 %v146_v13 }
  0x78   :  { %699 = vmatprep.mubr.f32.mxu1 %v147_v14 }
  0x7a   :  { %851 = vmatpush3.bf16.msra.mxu0 %v850_v10 }
  0x7b   :  { %852 = vmatprep.subr.bf16.mxu0 %v969_v0  ;;  %700 = vmatmul.mubr.f32.gmra.mrb[8].mxu1 %v148_v18 }
  0x7c   :  { %702 = vmatprep.mubr.f32.mxu1 %v149_v19 }
  0x7e   :  { %854 = vmatpush3.bf16.msra.mxu0 %v853_v15 }
  0x7f   :  { %855 = vmatprep.subr.bf16.mxu0 %v969_v0  ;;  %703 = vmatmul.mubr.f32.gmra.mrb[10].mxu1 %v150_v21 }
  0x80   :  { %705 = vmatprep.mubr.f32.mxu1 %v151_v22 }
  0x82   :  { %857 = vmatpush3.bf16.msra.mxu0 %v856_v20 }
  0x83   :  { %858 = vmatprep.subr.bf16.mxu0 %v969_v0  ;;  %706 = vmatmul.mubr.f32.gmra.mrb[12].mxu1 %v152_v23 }
  0x84   :  { %708 = vmatprep.mubr.f32.mxu1 %v153_v24 }
  0x86   :  { %860 = vmatpush3.bf16.msra.mxu0 %v859_v28 }
  0x87   :  { %709 = vmatmul.mubr.f32.gmra.mrb[14].mxu1 %v154_v25 }
  0x88   :  { %778 = vmatprep.mubr.msk.f32.mxu1 %vm970_vm0, %v971_v1 }
 0x13c   :  { %v132_v29 = vpop.f32.mrb[0].mxu0 }
 0x13d   :  { %vm136_vm1 = vcmp.gt.f32.partialorder %v132_v29, 0.0  ;;  %v137_v30 = vmul.f32 0.2, %v132_v29  ;;  %v654_v31 = vpop.f32.mrb[1].mxu0 }
 0x13e   :  { %v689_v33 = vpop.f32.mrb[0].mxu1 }
 0x13f   :  { %v138_v32 = vsel %vm136_vm1, %v132_v29, %v137_v30  ;;  %vm317_vm2 = vcmp.gt.f32.partialorder %v689_v33, 0.0  ;;  %v333_v34 = vmul.f32 0.2, %v689_v33  ;;  %v237_v1 = vpop.f32.mrb[1].mxu1 }
 0x140   :  { %744 = vmatmul.mubr.f32.vlgmr.msra.gmra.mrb[2].mxu0 %v138_v32  ;;  %vm316_vm3 = vcmp.gt.f32.partialorder %v237_v1, 0.0  ;;  %v332_v35 = vmul.f32 0.2, %v237_v1 }
 0x141   :  { %v349_v36 = vsel %vm317_vm2, %v689_v33, %v333_v34 }
 0x142   :  { %v348_v37 = vsel %vm316_vm3, %v237_v1, %v332_v35  ;;  %v692_v38 = vpop.f32.mrb[2].mxu1 }
 0x143   :  { %v862_v39 = vpack.c.bf16 %v349_v36, %v348_v37  ;;  %vm319_vm4 = vcmp.gt.f32.partialorder %v692_v38, 0.0  ;;  %v335_v40 = vmul.f32 0.2, %v692_v38  ;;  %v247_v41 = vpop.f32.mrb[3].mxu1 }
 0x144   :  { %vm318_vm5 = vcmp.gt.f32.partialorder %v247_v41, 0.0  ;;  %v334_v42 = vmul.f32 0.2, %v247_v41 }
 0x145   :  { %863 = vmatpush3.bf16.xpose.msra.mxu1 %v862_v39  ;;  %v351_v43 = vsel %vm319_vm4, %v692_v38, %v335_v40 }
 0x146   :  { %v350_v44 = vsel %vm318_vm5, %v247_v41, %v334_v42  ;;  %864 = vmatprep.subr.bf16.mxu1 %v969_v0  ;;  %v695_v45 = vpop.f32.mrb[4].mxu1 }
 0x147   :  { %v865_v46 = vpack.c.bf16 %v351_v43, %v350_v44  ;;  %vm321_vm6 = vcmp.gt.f32.partialorder %v695_v45, 0.0  ;;  %v337_v47 = vmul.f32 0.2, %v695_v45  ;;  %v257_v48 = vpop.f32.mrb[5].mxu1 }
 0x148   :  { %vm320_vm7 = vcmp.gt.f32.partialorder %v257_v48, 0.0  ;;  %v336_v49 = vmul.f32 0.2, %v257_v48 }
 0x149   :  { %v353_v50 = vsel %vm321_vm6, %v695_v45, %v337_v47 }
 0x14a   :  { %v352_v51 = vsel %vm320_vm7, %v257_v48, %v336_v49  ;;  %v698_v52 = vpop.f32.mrb[6].mxu1 }
 0x14b   :  { %v868_v53 = vpack.c.bf16 %v353_v50, %v352_v51  ;;  %vm323_vm8 = vcmp.gt.f32.partialorder %v698_v52, 0.0  ;;  %v339_v54 = vmul.f32 0.2, %v698_v52  ;;  %v267_v55 = vpop.f32.mrb[7].mxu1 }
 0x14c   :  { %vm322_vm9 = vcmp.gt.f32.partialorder %v267_v55, 0.0  ;;  %v338_v56 = vmul.f32 0.2, %v267_v55 }
 0x14d   :  { %866 = vmatpush3.bf16.xpose.msra.mxu1 %v865_v46  ;;  %v355_v57 = vsel %vm323_vm8, %v698_v52, %v339_v54 }
 0x14e   :  { %867 = vmatprep.subr.bf16.mxu1 %v969_v0  ;;  %v354_v58 = vsel %vm322_vm9, %v267_v55, %v338_v56  ;;  %v701_v59 = vpop.f32.mrb[8].mxu1 }
 0x14f   :  { %v871_v60 = vpack.c.bf16 %v355_v57, %v354_v58  ;;  %vm325_vm10 = vcmp.gt.f32.partialorder %v701_v59, 0.0  ;;  %v341_v61 = vmul.f32 0.2, %v701_v59  ;;  %v277_v62 = vpop.f32.mrb[9].mxu1 }
 0x150   :  { %vm324_vm11 = vcmp.gt.f32.partialorder %v277_v62, 0.0  ;;  %v340_v63 = vmul.f32 0.2, %v277_v62 }
 0x151   :  { %v357_v2 = vsel %vm325_vm10, %v701_v59, %v341_v61 }
 0x152   :  { %v356_v3 = vsel %vm324_vm11, %v277_v62, %v340_v63  ;;  %v704_v4 = vpop.f32.mrb[10].mxu1 }
 0x153   :  { %v874_v5 = vpack.c.bf16 %v357_v2, %v356_v3  ;;  %vm327_vm12 = vcmp.gt.f32.partialorder %v704_v4, 0.0  ;;  %v343_v6 = vmul.f32 0.2, %v704_v4  ;;  %v287_v7 = vpop.f32.mrb[11].mxu1 }
 0x154   :  { %vm326_vm13 = vcmp.gt.f32.partialorder %v287_v7, 0.0  ;;  %v342_v8 = vmul.f32 0.2, %v287_v7 }
 0x155   :  { %869 = vmatpush3.bf16.xpose.msra.mxu1 %v868_v53  ;;  %v359_v9 = vsel %vm327_vm12, %v704_v4, %v343_v6 }
 0x156   :  { %870 = vmatprep.subr.bf16.mxu1 %v969_v0  ;;  %v358_v10 = vsel %vm326_vm13, %v287_v7, %v342_v8  ;;  %v707_v11 = vpop.f32.mrb[12].mxu1 }
 0x157   :  { %v877_v12 = vpack.c.bf16 %v359_v9, %v358_v10  ;;  %vm329_vm14 = vcmp.gt.f32.partialorder %v707_v11, 0.0  ;;  %v345_v13 = vmul.f32 0.2, %v707_v11  ;;  %v297_v14 = vpop.f32.mrb[13].mxu1 }
 0x158   :  { %vm328_vm15 = vcmp.gt.f32.partialorder %v297_v14, 0.0  ;;  %v344_v15 = vmul.f32 0.2, %v297_v14 }
 0x159   :  { %v361_v16 = vsel %vm329_vm14, %v707_v11, %v345_v13 }
 0x15a   :  { %v360_v17 = vsel %vm328_vm15, %v297_v14, %v344_v15  ;;  %v710_v18 = vpop.f32.mrb[14].mxu1 }
 0x15b   :  { %v880_v19 = vpack.c.bf16 %v361_v16, %v360_v17  ;;  %vm331_vm0 = vcmp.gt.f32.partialorder %v710_v18, 0.0  ;;  %v347_v20 = vmul.f32 0.2, %v710_v18  ;;  %v307_v21 = vpop.f32.mrb[15].mxu1 }
 0x15c   :  { %vm330_vm1 = vcmp.gt.f32.partialorder %v307_v21, 0.0  ;;  %v346_v22 = vmul.f32 0.2, %v307_v21 }
 0x15d   :  { %872 = vmatpush3.bf16.xpose.msra.mxu1 %v871_v60  ;;  %v363_v23 = vsel %vm331_vm0, %v710_v18, %v347_v20 }
 0x15e   :  { %873 = vmatprep.subr.bf16.mxu1 %v969_v0  ;;  %v362_v24 = vsel %vm330_vm1, %v307_v21, %v346_v22 }
 0x15f   :  { %v883_v25 = vpack.c.bf16 %v363_v23, %v362_v24 }
 0x165   :  { %875 = vmatpush3.bf16.xpose.msra.mxu1 %v874_v5 }
 0x166   :  { %876 = vmatprep.subr.bf16.mxu1 %v969_v0 }
 0x16d   :  { %878 = vmatpush3.bf16.xpose.msra.mxu1 %v877_v12 }
 0x16e   :  { %879 = vmatprep.subr.bf16.mxu1 %v969_v0 }
 0x175   :  { %881 = vmatpush3.bf16.xpose.msra.mxu1 %v880_v19 }
 0x176   :  { %882 = vmatprep.subr.bf16.mxu1 %v969_v0 }
 0x17d   :  { %884 = vmatpush3.bf16.xpose.msra.mxu1 %v883_v25 }
 0x213   :  { %v446_v26 = vpop.f32.mrb[2].mxu0 }
 0x214   :  { %v745_v27 = vpop.f32.mrb[3].mxu0  ;;  %779 = vmatmul.mubr.f32.vlgmr.msra.gmra.mrb[16].mxu1 %v446_v26 }
 0x2e7   :  { %v516_v28 = vpop.f32.mrb[16].mxu1 }
 0x2e8   :  { %520 = vst [vmem:[#allocation7] sm:$0xff] %v516_v28  ;;  %v780_v29 = vpop.f32.mrb[17].mxu1 }
 0x2e9   :  { %948 = shalt.err (!%p945_p6)
}
 0x2ea   :  { %s949_s0 = scalar_lea.hbm %s1173_s5, 128 }
 0x2eb   :  { %p950_p7 = scmp.ne.s32.totalorder %s1173_s5, %s949_s0  ;;  %p953_p8 = scmp.lt.u32.totalorder %s949_s0, %s1173_s5 }
 0x2ed   :  { %p955_p9 = pnand %p953_p8, %p950_p7 }
 0x2ef   :  { %958 = shalt.err (!%p955_p9)
}
 0x2f0   :  { %530 = dma.vmem_to_hbm [thread:$0]  %s528_s4, 128, %s1173_s5, [#allocation4]  }
 0x2f1   :  { %963 = dma.done.wait [#allocation4], 128  }
 0x2f2   :  { %964 = vsyncadd [#allocation4], 4294967168 }
 0x2f3   :  { %534 = vsyncpa [#allocation3], 1 }
 0x2f4   :  { %535 = vsyncpa [#allocation6], 1 }
 0x2f5   :  { %536 = vsyncpa [#allocation4], 1 }

</bundles_post_ra>
